<compile_context>
chip_gen: v7x
topology: tpu7x:2x2x1
jax: 0.10.0
libtpu: 0.0.40
codegen_flags: <defaults>
</compile_context>

<pallas_src>
import functools

import jax
import jax.numpy as jnp
from jax import lax
from jax.experimental import pallas as pl
from jax.experimental.pallas import tpu as pltpu

LANE = 128
SUBLANE = 8
ROW_ALIGN = 16                       # valid row granularity for f32 and bf16
TARGET_TILE_ROWS = 8192              # 8192 x 128 x 4B = 4 MiB per f32 block
VMEM_LIMIT_BYTES = 48 * 1024 * 1024  # fits v5e/v6e (128 MiB) and v7x (64 MiB)


def _asym_sim_kernel(yp_ref, y_ref, out_ref, *, tile_rows, valid_rows):
    """Accumulate [sum(yp*y), sum(yp), sum(y)] lane partials into a resident
    (3, 1, LANE) output block while streaming (tile_rows, LANE) input tiles."""
    i = pl.program_id(0)

    @pl.when(i == 0)
    def _init():
        out_ref[...] = jnp.zeros_like(out_ref)

    yp = yp_ref[...].astype(jnp.float32)
    yv = y_ref[...].astype(jnp.float32)

    def accumulate(a, b):
        # Column sums: VPU vreg-add tree over the row dimension + one tiny
        # cross-sublane reduce; only a single vreg per statistic is RMW'd.
        out_ref[0] += jnp.sum(a * b, axis=0, keepdims=True)   # sum(yp * y)
        out_ref[1] += jnp.sum(a, axis=0, keepdims=True)       # sum(yp)
        out_ref[2] += jnp.sum(b, axis=0, keepdims=True)       # sum(y)

    block_start = i * tile_rows
    fully_valid = block_start + tile_rows <= valid_rows

    # Interior blocks: plain VPU work, no mask.
    @pl.when(fully_valid)
    def _fast():
        accumulate(yp, yv)

    # Ragged last block: rows past the array hold unspecified data -> select
    # (not multiply) them to zero before accumulating.
    @pl.when(jnp.logical_not(fully_valid))
    def _ragged():
        row_idx = block_start + lax.broadcasted_iota(jnp.int32, yp.shape, 0)
        mask = row_idx < valid_rows
        zero = jnp.zeros_like(yp)
        accumulate(jnp.where(mask, yp, zero), jnp.where(mask, yv, zero))


def _keep_or_cast(x):
    # Stream f32 / bf16 as-is (cast happens in-kernel); anything else -> f32.
    if x.dtype == jnp.float32 or x.dtype == jnp.bfloat16:
        return x
    return x.astype(jnp.float32)


def _asym_sufficient_stats(y_pred, y):
    """Returns (sum(yp*y), sum(yp), sum(y)) as float32 scalars."""
    y_pred = _keep_or_cast(y_pred)
    y = _keep_or_cast(y)

    yp_flat = jnp.ravel(y_pred)
    y_flat = jnp.ravel(y)
    n = yp_flat.shape[0]

    n_main = (n // LANE) * LANE
    rem = n - n_main

    # <=127-element tail handled with a tiny jnp reduction instead of a full
    # pad copy of both tensors.
    if rem:
        t_yp = yp_flat[n_main:].astype(jnp.float32)
        t_y = y_flat[n_main:].astype(jnp.float32)
        tail = jnp.stack([jnp.sum(t_yp * t_y), jnp.sum(t_yp), jnp.sum(t_y)])
    else:
        tail = jnp.zeros((3,), jnp.float32)

    if n_main == 0:
        return tail[0], tail[1], tail[2]

    rows = n_main // LANE
    yp2d = (yp_flat[:n_main] if rem else yp_flat).reshape(rows, LANE)
    y2d = (y_flat[:n_main] if rem else y_flat).reshape(rows, LANE)

    if rows < ROW_ALIGN:
        # Tiny inputs only: zero-pad rows (zeros contribute nothing) so the
        # single block satisfies the sublane tiling constraint.
        pad_rows = ROW_ALIGN - rows
        yp2d = jnp.pad(yp2d, ((0, pad_rows), (0, 0)))
        y2d = jnp.pad(y2d, ((0, pad_rows), (0, 0)))
        rows = ROW_ALIGN

    tile_rows = min(TARGET_TILE_ROWS, (rows // ROW_ALIGN) * ROW_ALIGN)
    steps = pl.cdiv(rows, tile_rows)

    kernel = functools.partial(
        _asym_sim_kernel, tile_rows=tile_rows, valid_rows=rows)

    in_bytes = (yp2d.size * yp2d.dtype.itemsize
                + y2d.size * y2d.dtype.itemsize)
    out_bytes = 3 * LANE * 4

    partials = pl.pallas_call(
        kernel,
        out_shape=jax.ShapeDtypeStruct((3, 1, LANE), jnp.float32),
        grid_spec=pltpu.PrefetchScalarGridSpec(
            num_scalar_prefetch=0,
            grid=(steps,),
            in_specs=[
                pl.BlockSpec((tile_rows, LANE), lambda i: (i, 0)),
                pl.BlockSpec((tile_rows, LANE), lambda i: (i, 0)),
            ],
            out_specs=pl.BlockSpec((3, 1, LANE), lambda i: (0, 0, 0)),
        ),
        compiler_params=pltpu.CompilerParams(
            dimension_semantics=("arbitrary",),
            vmem_limit_bytes=VMEM_LIMIT_BYTES,
        ),
        cost_estimate=pl.CostEstimate(
            flops=4 * int(n_main),
            transcendentals=0,
            bytes_accessed=int(in_bytes + out_bytes),
        ),
    )(yp2d, y2d)

    sums = jnp.sum(partials, axis=(1, 2)) + tail   # (3,)
    return sums[0], sums[1], sums[2]


class AsymSimilarityLossPallas:
    """Pallas implementation of AsymSimilarityLoss.forward.

    `lambda1` and `model` are unused in the reference forward pass; they are
    kept only for signature parity.
    """

    def __init__(self, beta: float, lambda1: float = 0.0):
        self.beta = float(beta)
        self.lambda1 = float(lambda1)  # unused in forward (matches PyTorch)

    def __call__(self, model, y_pred: jax.Array, y: jax.Array) -> jax.Array:
        del model  # unused, matches reference semantics
        s_py, s_p, s_y = _asym_sufficient_stats(y_pred, y)
        b2 = jnp.float32(self.beta * self.beta)
        nom = (1.0 + b2) * s_py
        # sum((1-yp)*y) = s_y - s_py ; sum(yp*(1-y)) = s_p - s_py
        denom = nom + b2 * (s_y - s_py) + (s_p - s_py)
        return nom / denom


def _reference(beta, y_pred, y):
    yp = y_pred.astype(jnp.float32)
    yf = y.astype(jnp.float32)
    nom = (1.0 + beta ** 2) * jnp.sum(yp * yf)
    denom = nom + beta ** 2 * jnp.sum((1.0 - yp) * yf) + jnp.sum(yp * (1.0 - yf))
    return nom / denom


if __name__ == "__main__":
    key = jax.random.PRNGKey(0)
    k1, k2, k3, k4, k5, k6 = jax.random.split(key, 6)

    beta, lambda1 = 1.5, 0.01
    loss_mod = AsymSimilarityLossPallas(beta=beta, lambda1=lambda1)

    # 1) Segmentation-style input: N, C, H, W (128-aligned element count).
    shape = (2, 4, 16, 16)
    y_pred = jax.nn.sigmoid(jax.random.normal(k1, shape, dtype=jnp.float32))
    y = (jax.random.uniform(k2, shape) > 0.5).astype(jnp.float32)
    loss = loss_mod(None, y_pred, y)
    jax.block_until_ready(loss)
    ref = _reference(beta, y_pred, y)
    assert jnp.allclose(loss, ref, rtol=1e-5, atol=1e-6), (loss, ref)

    # 2) Tiny ragged shape: exercises the wrapper-side tail fold + row padding.
    shape2 = (2, 3, 7, 11)
    y_pred2 = jax.nn.sigmoid(jax.random.normal(k3, shape2, dtype=jnp.float32))
    y2 = (jax.random.uniform(k4, shape2) > 0.5).astype(jnp.float32)
    loss2 = loss_mod(None, y_pred2, y2)
    jax.block_until_ready(loss2)
    ref2 = _reference(beta, y_pred2, y2)
    assert jnp.allclose(loss2, ref2, rtol=1e-5, atol=1e-6), (loss2, ref2)

    # 3) Multi-step ragged shape with bf16 predictions: exercises the masked
    #    edge block, the multi-iteration grid and the bf16 streaming path.
    shape3 = (3, 5, 33, 33)
    y_pred3 = jax.nn.sigmoid(
        jax.random.normal(k5, shape3, dtype=jnp.float32)).astype(jnp.bfloat16)
    y3 = (jax.random.uniform(k6, shape3) > 0.5).astype(jnp.float32)
    loss3 = loss_mod(None, y_pred3, y3)
    jax.block_until_ready(loss3)
    ref3 = _reference(beta, y_pred3, y3)
    assert jnp.allclose(loss3, ref3, rtol=1e-5, atol=1e-6), (loss3, ref3)

    print("KERNEL_OK")
</pallas_src>

<mosaic_0001>
module attributes {stable_mosaic.version = 11 : i64} {
  func.func @_asym_sim_kernel(%arg0: i32, %arg1: memref<16x128xf32, #tpu.memory_space<vmem>>, %arg2: memref<16x128xf32, #tpu.memory_space<vmem>>, %arg3: memref<3x1x128xf32, #tpu.memory_space<vmem>>) attributes {dimension_semantics = [#tpu.dimension_semantics<arbitrary>], iteration_bounds = array<i64: 1>, scalar_prefetch = 0 : i64, scratch_operands = 0 : i64, tpu.core_type = #tpu.core_type<tc>, window_params = [{transform_indices = @transform_0, window_bounds = array<i64: 16, 128>}, {transform_indices = @transform_1, window_bounds = array<i64: 16, 128>}, {pipeline_mode = #tpu.pipeline_mode<synchronous>, transform_indices = @transform_2, window_bounds = array<i64: 3, 1, 128>}]} {
    %c0_i32 = arith.constant 0 : i32
    %0 = arith.cmpi eq, %arg0, %c0_i32 : i32
    %1 = arith.extui %0 : i1 to i32
    %c0_i32_0 = arith.constant 0 : i32
    %2 = arith.cmpi ne, %1, %c0_i32_0 : i32
    scf.if %2 {
      %cst = arith.constant 0.000000e+00 : f32
      %13 = vector.broadcast %cst : f32 to vector<3x1x128xf32>
      %c0_8 = arith.constant 0 : index
      %c0_9 = arith.constant 0 : index
      %c0_10 = arith.constant 0 : index
      %14 = vector.load %arg3[%c0_8, %c0_9, %c0_10] : memref<3x1x128xf32, #tpu.memory_space<vmem>>, vector<3x1x128xf32>
      tpu.vector_store %arg3[%c0_8, %c0_9, %c0_10], %13 {strides = array<i32>} : memref<3x1x128xf32, #tpu.memory_space<vmem>>, vector<3x1x128xf32>,
    } else {
    }
    %c0 = arith.constant 0 : index
    %c0_1 = arith.constant 0 : index
    %3 = vector.load %arg1[%c0, %c0_1] : memref<16x128xf32, #tpu.memory_space<vmem>>, vector<16x128xf32>
    %c0_2 = arith.constant 0 : index
    %c0_3 = arith.constant 0 : index
    %4 = vector.load %arg2[%c0_2, %c0_3] : memref<16x128xf32, #tpu.memory_space<vmem>>, vector<16x128xf32>
    %c16_i32 = arith.constant 16 : i32
    %5 = arith.muli %arg0, %c16_i32 : i32
    %c16_i32_4 = arith.constant 16 : i32
    %6 = arith.addi %5, %c16_i32_4 : i32
    %c16_i32_5 = arith.constant 16 : i32
    %7 = arith.cmpi sle, %6, %c16_i32_5 : i32
    %8 = arith.extui %7 : i1 to i32
    %c0_i32_6 = arith.constant 0 : i32
    %9 = arith.cmpi ne, %8, %c0_i32_6 : i32
    scf.if %9 {
      %c0_8 = arith.constant 0 : index
      %c0_9 = arith.constant 0 : index
      %c0_10 = arith.constant 0 : index
      %13 = vector.load %arg3[%c0_8, %c0_9, %c0_10] : memref<3x1x128xf32, #tpu.memory_space<vmem>>, vector<1x1x128xf32>
      %14 = vector.shape_cast %13 : vector<1x1x128xf32> to vector<1x128xf32>
      %15 = arith.mulf %3, %4 : vector<16x128xf32>
      %cst = arith.constant dense<0.000000e+00> : vector<128xf32>
      %16 = vector.multi_reduction <add>, %15, %cst [0] : vector<16x128xf32> to vector<128xf32>
      %17 = vector.shape_cast %16 : vector<128xf32> to vector<1x128xf32>
      %18 = arith.addf %14, %17 : vector<1x128xf32>
      %c0_11 = arith.constant 0 : index
      %c0_12 = arith.constant 0 : index
      %c0_13 = arith.constant 0 : index
      %19 = vector.load %arg3[%c0_11, %c0_12, %c0_13] : memref<3x1x128xf32, #tpu.memory_space<vmem>>, vector<1x1x128xf32>
      %20 = vector.shape_cast %19 : vector<1x1x128xf32> to vector<1x128xf32>
      %21 = vector.shape_cast %18 : vector<1x128xf32> to vector<1x1x128xf32>
      tpu.vector_store %arg3[%c0_11, %c0_12, %c0_13], %21 {strides = array<i32>} : memref<3x1x128xf32, #tpu.memory_space<vmem>>, vector<1x1x128xf32>,
      %c1 = arith.constant 1 : index
      %c0_14 = arith.constant 0 : index
      %c0_15 = arith.constant 0 : index
      %22 = vector.load %arg3[%c1, %c0_14, %c0_15] : memref<3x1x128xf32, #tpu.memory_space<vmem>>, vector<1x1x128xf32>
      %23 = vector.shape_cast %22 : vector<1x1x128xf32> to vector<1x128xf32>
      %cst_16 = arith.constant dense<0.000000e+00> : vector<128xf32>
      %24 = vector.multi_reduction <add>, %3, %cst_16 [0] : vector<16x128xf32> to vector<128xf32>
      %25 = vector.shape_cast %24 : vector<128xf32> to vector<1x128xf32>
      %26 = arith.addf %23, %25 : vector<1x128xf32>
      %c1_17 = arith.constant 1 : index
      %c0_18 = arith.constant 0 : index
      %c0_19 = arith.constant 0 : index
      %27 = vector.load %arg3[%c1_17, %c0_18, %c0_19] : memref<3x1x128xf32, #tpu.memory_space<vmem>>, vector<1x1x128xf32>
      %28 = vector.shape_cast %27 : vector<1x1x128xf32> to vector<1x128xf32>
      %29 = vector.shape_cast %26 : vector<1x128xf32> to vector<1x1x128xf32>
      tpu.vector_store %arg3[%c1_17, %c0_18, %c0_19], %29 {strides = array<i32>} : memref<3x1x128xf32, #tpu.memory_space<vmem>>, vector<1x1x128xf32>,
      %c2 = arith.constant 2 : index
      %c0_20 = arith.constant 0 : index
      %c0_21 = arith.constant 0 : index
      %30 = vector.load %arg3[%c2, %c0_20, %c0_21] : memref<3x1x128xf32, #tpu.memory_space<vmem>>, vector<1x1x128xf32>
      %31 = vector.shape_cast %30 : vector<1x1x128xf32> to vector<1x128xf32>
      %cst_22 = arith.constant dense<0.000000e+00> : vector<128xf32>
      %32 = vector.multi_reduction <add>, %4, %cst_22 [0] : vector<16x128xf32> to vector<128xf32>
      %33 = vector.shape_cast %32 : vector<128xf32> to vector<1x128xf32>
      %34 = arith.addf %31, %33 : vector<1x128xf32>
      %c2_23 = arith.constant 2 : index
      %c0_24 = arith.constant 0 : index
      %c0_25 = arith.constant 0 : index
      %35 = vector.load %arg3[%c2_23, %c0_24, %c0_25] : memref<3x1x128xf32, #tpu.memory_space<vmem>>, vector<1x1x128xf32>
      %36 = vector.shape_cast %35 : vector<1x1x128xf32> to vector<1x128xf32>
      %37 = vector.shape_cast %34 : vector<1x128xf32> to vector<1x1x128xf32>
      tpu.vector_store %arg3[%c2_23, %c0_24, %c0_25], %37 {strides = array<i32>} : memref<3x1x128xf32, #tpu.memory_space<vmem>>, vector<1x1x128xf32>,
    } else {
    }
    %true = arith.constant true
    %10 = arith.xori %7, %true : i1
    %11 = arith.extui %10 : i1 to i32
    %c0_i32_7 = arith.constant 0 : i32
    %12 = arith.cmpi ne, %11, %c0_i32_7 : i32
    scf.if %12 {
      %13 = tpu.iota {dimensions = array<i32: 0>} : vector<16x128xi32>
      %14 = vector.broadcast %5 : i32 to vector<16x128xi32>
      %15 = arith.addi %14, %13 : vector<16x128xi32>
      %c16_i32_8 = arith.constant 16 : i32
      %16 = vector.broadcast %c16_i32_8 : i32 to vector<16x128xi32>
      %17 = arith.cmpi slt, %15, %16 : vector<16x128xi32>
      %cst = arith.constant 0.000000e+00 : f32
      %18 = vector.broadcast %cst : f32 to vector<16x128xf32>
      %19 = arith.select %17, %3, %18 : vector<16x128xi1>, vector<16x128xf32>
      %20 = arith.select %17, %4, %18 : vector<16x128xi1>, vector<16x128xf32>
      %c0_9 = arith.constant 0 : index
      %c0_10 = arith.constant 0 : index
      %c0_11 = arith.constant 0 : index
      %21 = vector.load %arg3[%c0_9, %c0_10, %c0_11] : memref<3x1x128xf32, #tpu.memory_space<vmem>>, vector<1x1x128xf32>
      %22 = vector.shape_cast %21 : vector<1x1x128xf32> to vector<1x128xf32>
      %23 = arith.mulf %19, %20 : vector<16x128xf32>
      %cst_12 = arith.constant dense<0.000000e+00> : vector<128xf32>
      %24 = vector.multi_reduction <add>, %23, %cst_12 [0] : vector<16x128xf32> to vector<128xf32>
      %25 = vector.shape_cast %24 : vector<128xf32> to vector<1x128xf32>
      %26 = arith.addf %22, %25 : vector<1x128xf32>
      %c0_13 = arith.constant 0 : index
      %c0_14 = arith.constant 0 : index
      %c0_15 = arith.constant 0 : index
      %27 = vector.load %arg3[%c0_13, %c0_14, %c0_15] : memref<3x1x128xf32, #tpu.memory_space<vmem>>, vector<1x1x128xf32>
      %28 = vector.shape_cast %27 : vector<1x1x128xf32> to vector<1x128xf32>
      %29 = vector.shape_cast %26 : vector<1x128xf32> to vector<1x1x128xf32>
      tpu.vector_store %arg3[%c0_13, %c0_14, %c0_15], %29 {strides = array<i32>} : memref<3x1x128xf32, #tpu.memory_space<vmem>>, vector<1x1x128xf32>,
      %c1 = arith.constant 1 : index
      %c0_16 = arith.constant 0 : index
      %c0_17 = arith.constant 0 : index
      %30 = vector.load %arg3[%c1, %c0_16, %c0_17] : memref<3x1x128xf32, #tpu.memory_space<vmem>>, vector<1x1x128xf32>
      %31 = vector.shape_cast %30 : vector<1x1x128xf32> to vector<1x128xf32>
      %cst_18 = arith.constant dense<0.000000e+00> : vector<128xf32>
      %32 = vector.multi_reduction <add>, %19, %cst_18 [0] : vector<16x128xf32> to vector<128xf32>
      %33 = vector.shape_cast %32 : vector<128xf32> to vector<1x128xf32>
      %34 = arith.addf %31, %33 : vector<1x128xf32>
      %c1_19 = arith.constant 1 : index
      %c0_20 = arith.constant 0 : index
      %c0_21 = arith.constant 0 : index
      %35 = vector.load %arg3[%c1_19, %c0_20, %c0_21] : memref<3x1x128xf32, #tpu.memory_space<vmem>>, vector<1x1x128xf32>
      %36 = vector.shape_cast %35 : vector<1x1x128xf32> to vector<1x128xf32>
      %37 = vector.shape_cast %34 : vector<1x128xf32> to vector<1x1x128xf32>
      tpu.vector_store %arg3[%c1_19, %c0_20, %c0_21], %37 {strides = array<i32>} : memref<3x1x128xf32, #tpu.memory_space<vmem>>, vector<1x1x128xf32>,
      %c2 = arith.constant 2 : index
      %c0_22 = arith.constant 0 : index
      %c0_23 = arith.constant 0 : index
      %38 = vector.load %arg3[%c2, %c0_22, %c0_23] : memref<3x1x128xf32, #tpu.memory_space<vmem>>, vector<1x1x128xf32>
      %39 = vector.shape_cast %38 : vector<1x1x128xf32> to vector<1x128xf32>
      %cst_24 = arith.constant dense<0.000000e+00> : vector<128xf32>
      %40 = vector.multi_reduction <add>, %20, %cst_24 [0] : vector<16x128xf32> to vector<128xf32>
      %41 = vector.shape_cast %40 : vector<128xf32> to vector<1x128xf32>
      %42 = arith.addf %39, %41 : vector<1x128xf32>
      %c2_25 = arith.constant 2 : index
      %c0_26 = arith.constant 0 : index
      %c0_27 = arith.constant 0 : index
      %43 = vector.load %arg3[%c2_25, %c0_26, %c0_27] : memref<3x1x128xf32, #tpu.memory_space<vmem>>, vector<1x1x128xf32>
      %44 = vector.shape_cast %43 : vector<1x1x128xf32> to vector<1x128xf32>
      %45 = vector.shape_cast %42 : vector<1x128xf32> to vector<1x1x128xf32>
      tpu.vector_store %arg3[%c2_25, %c0_26, %c0_27], %45 {strides = array<i32>} : memref<3x1x128xf32, #tpu.memory_space<vmem>>, vector<1x1x128xf32>,
    } else {
    }
    return
  }
  func.func @transform_0(%arg0: i32) -> (i32, i32) {
    %c0_i32 = arith.constant 0 : i32
    %c0_i32_0 = arith.constant 0 : i32
    return %arg0, %c0_i32 : i32, i32
  }
  func.func @transform_1(%arg0: i32) -> (i32, i32) {
    %c0_i32 = arith.constant 0 : i32
    %c0_i32_0 = arith.constant 0 : i32
    return %arg0, %c0_i32 : i32, i32
  }
  func.func @transform_2(%arg0: i32) -> (i32, i32, i32) {
    %c0_i32 = arith.constant 0 : i32
    %c0_i32_0 = arith.constant 0 : i32
    %c0_i32_1 = arith.constant 0 : i32
    %c0_i32_2 = arith.constant 0 : i32
    return %c0_i32, %c0_i32_0, %c0_i32_1 : i32, i32, i32
  }
}

</mosaic_0001>

<bundles_post_ra>
// kernel: tpu_custom_call.1
= control target key start
LH: loop header
LB: loop body
LE: loop exit
PB: predicated region body
PF: predicated region fallthrough
CT: control target
= control target key end

     0   :  { %7 = vsyncpa [#allocation3], 0  ;;  %s298_s0 = inlined_call_operand.hbm [shape: f32[16,128], index: 0, kind: input, shape index: {}]   ;;  %s299_s1 = inlined_call_operand.hbm [shape: f32[16,128], index: 1, kind: input, shape index: {}]   ;;  %s300_s2 = inlined_call_operand.hbm [shape: f32[3,1,128], index: 2, kind: output, shape index: {}]  }
   0x1   :  { %8 = vsyncpa [#allocation6], 0 }
   0x2   :  { %9 = vsyncpa [#allocation4], 0  ;;  %s239_s9 = smov [#allocation2]   ;;  %s167_s13 = scalar_lea.hbm %s298_s0, 256 }
   0x3   :  { %s15_s10 = sshll.u32 %s239_s9, 4  ;;  %p168_p0 = scmp.ne.s32.totalorder %s298_s0, %s167_s13  ;;  %s16_s10 = int_to_ptr.vmem [resolvable:$true] %s15_s10 }
   0x4   :  { %p171_p1 = scmp.lt.u32.totalorder %s167_s13, %s298_s0 }
   0x6   :  { %p173_p2 = pnand %p171_p1, %p168_p0 }
   0x8   :  { %176 = shalt.err (!%p173_p2)
}
   0x9   :  { %s177_s18 = scalar_lea.vmem %s16_s10, 256  ;;  %p182_p4 = scmp.lt.s32.totalorder %s16_s10, %s16_s10 }
   0xa   :  { %p178_p3 = scmp.ne.s32.totalorder %s16_s10, %s177_s18  ;;  %p183_p5 = scmp.lt.s32.totalorder %s177_s18, %s177_s18 }
   0xc   :  { %p184_p6 = por %p183_p5, %p182_p4 }
   0xe   :  { %p185_p7 = pnand %p184_p6, %p178_p3 }
  0x10   :  { %188 = shalt.err (!%p185_p7)
}
  0x11   :  { %s240_s19 = smov 128   ;;  %s241_s20 = smov 8  }
  0x12   :  { %21 = dma.hbm_to_vmem [thread:$0]  %s298_s0, 256, %s16_s10, [#allocation3], %s240_s19, %s240_s19, %s241_s20  }
  0x13   :  { %s242_s23 = smov [#allocation5]   ;;  %s189_s27 = scalar_lea.hbm %s299_s1, 256 }
  0x14   :  { %s27_s24 = sshll.u32 %s242_s23, 4  ;;  %p190_p8 = scmp.ne.s32.totalorder %s299_s1, %s189_s27  ;;  %s28_s24 = int_to_ptr.vmem [resolvable:$true] %s27_s24 }
  0x15   :  { %p193_p9 = scmp.lt.u32.totalorder %s189_s27, %s299_s1 }
  0x17   :  { %p195_p10 = pnand %p193_p9, %p190_p8 }
  0x19   :  { %198 = shalt.err (!%p195_p10)
}
  0x1a   :  { %s199_s4 = scalar_lea.vmem %s28_s24, 256  ;;  %p204_p12 = scmp.lt.s32.totalorder %s28_s24, %s28_s24 }
  0x1b   :  { %p200_p11 = scmp.ne.s32.totalorder %s28_s24, %s199_s4  ;;  %p205_p13 = scmp.lt.s32.totalorder %s199_s4, %s199_s4 }
  0x1d   :  { %p206_p0 = por %p205_p13, %p204_p12 }
  0x1f   :  { %p207_p1 = pnand %p206_p0, %p200_p11 }
  0x21   :  { %210 = shalt.err (!%p207_p1)
}
  0x22   :  { %33 = dma.hbm_to_vmem [thread:$0]  %s299_s1, 256, %s28_s24, [#allocation6], %s240_s19, %s240_s19, %s241_s20  }
  0x23   :  { %233 = dma.done.wait [#allocation3], 256  }
  0x24   :  { %234 = vsyncadd [#allocation3], 4294967040 }
  0x25   :  { %235 = dma.done.wait [#allocation6], 256  }
  0x26   :  { %236 = vsyncadd [#allocation6], 4294967040  ;;  %v243_v0 = vmov 0.0   ;;  %v47_v1 = vld [vmem:[#allocation2] sm:$0xff]  ;;  %v48_v2 = vld [vmem:[#allocation2 + $0x8] sm:$0xff]  ;;  %s244_s1 = smov [#allocation7]  }
  0x27   :  { %44 = vst [vmem:[#allocation7] sm:$0x1] %v243_v0  ;;  %45 = vst [vmem:[#allocation7 + $0x1] sm:$0x1] %v243_v0  ;;  %v49_v3 = vld [vmem:[#allocation5] sm:$0xff]  ;;  %v50_v4 = vld [vmem:[#allocation5 + $0x8] sm:$0xff]  ;;  %v71_v6 = vadd.f32 %v48_v2, %v47_v1 }
  0x28   :  { %46 = vst [vmem:[#allocation7 + $0x2] sm:$0x1] %v243_v0  ;;  %v58_v5 = vmul.f32 %v49_v3, %v47_v1  ;;  %v59_v7 = vmul.f32 %v50_v4, %v48_v2  ;;  %v82_v8 = vadd.f32 %v50_v4, %v49_v3  ;;  %s146_s6 = sshll.u32 %s244_s1, 4  ;;  %s147_s6 = int_to_ptr.vmem [resolvable:$true] %s146_s6 }
  0x29   :  { %v72_v9 = vrot.slane %v71_v6, 4  ;;  %s211_s7 = scalar_lea.vmem %s147_s6, 48  ;;  %s215_s8 = scalar_lea.vmem %s147_s6, 64 }
  0x2a   :  { %v60_v10 = vadd.f32 %v59_v7, %v58_v5  ;;  %v83_v11 = vrot.slane %v82_v8, 4  ;;  %p212_p2 = scmp.ne.s32.totalorder %s147_s6, %s211_s7  ;;  %p216_p3 = scmp.lt.s32.totalorder %s147_s6, %s147_s6 }
  0x2b   :  { %v73_v12 = vadd.f32 %v72_v9, %v71_v6  ;;  %p217_p4 = scmp.lt.s32.totalorder %s215_s8, %s211_s7 }
  0x2c   :  { %v61_v13 = vrot.slane %v60_v10, 4  ;;  %v84_v14 = vadd.f32 %v83_v11, %v82_v8 }
  0x2d   :  { %v74_v15 = vrot.slane %v73_v12, 2  ;;  %p218_p5 = por %p217_p4, %p216_p3 }
  0x2e   :  { %v62_v16 = vadd.f32 %v61_v13, %v60_v10  ;;  %v85_v17 = vrot.slane %v84_v14, 2  ;;  %v70_v23 = vld [vmem:[#allocation7 + $0x1] sm:$0x1]  ;;  %v57_v29 = vld [vmem:[#allocation7] sm:$0x1] }
  0x2f   :  { %v75_v18 = vadd.f32 %v74_v15, %v73_v12  ;;  %v81_v26 = vld [vmem:[#allocation7 + $0x2] sm:$0x1]  ;;  %p219_p6 = pnand %p218_p5, %p212_p2 }
  0x30   :  { %v63_v19 = vrot.slane %v62_v16, 2  ;;  %v86_v20 = vadd.f32 %v85_v17, %v84_v14 }
  0x31   :  { %v76_v21 = vrot.slane %v75_v18, 1 }
  0x32   :  { %v64_v22 = vadd.f32 %v63_v19, %v62_v16  ;;  %v87_v24 = vrot.slane %v86_v20, 1 }
  0x33   :  { %v77_v25 = vadd.f32 %v76_v21, %v75_v18 }
  0x34   :  { %v65_v27 = vrot.slane %v64_v22, 1  ;;  %v88_v28 = vadd.f32 %v87_v24, %v86_v20 }
  0x35   :  { %v78_v30 = vadd.f32 %v77_v25, %v70_v23 }
  0x36   :  { %v66_v31 = vadd.f32 %v65_v27, %v64_v22  ;;  %v89_v32 = vadd.f32 %v88_v28, %v81_v26 }
  0x37   :  { %79 = vst [vmem:[#allocation7 + $0x1] sm:$0x1] %v78_v30 }
  0x38   :  { %v67_v33 = vadd.f32 %v66_v31, %v57_v29  ;;  %90 = vst [vmem:[#allocation7 + $0x2] sm:$0x1] %v89_v32 }
  0x3a   :  { %68 = vst [vmem:[#allocation7] sm:$0x1] %v67_v33 }
  0x3b   :  { %222 = shalt.err (!%p219_p6)
}
  0x3c   :  { %s223_s11 = scalar_lea.hbm %s300_s2, 48 }
  0x3d   :  { %p224_p7 = scmp.ne.s32.totalorder %s300_s2, %s223_s11  ;;  %p227_p8 = scmp.lt.u32.totalorder %s223_s11, %s300_s2 }
  0x3f   :  { %p229_p9 = pnand %p227_p8, %p224_p7 }
  0x41   :  { %232 = shalt.err (!%p229_p9)
}
  0x42   :  { %s245_s16 = smov 16   ;;  %s246_s17 = smov 1  }
  0x43   :  { %152 = dma.vmem_to_hbm [thread:$0]  %s147_s6, 48, %s300_s2, [#allocation4], %s245_s16, %s245_s16, %s246_s17  }
  0x44   :  { %237 = dma.done.wait [#allocation4], 48  }
  0x45   :  { %238 = vsyncadd [#allocation4], 4294967248 }
  0x46   :  { %156 = vsyncpa [#allocation3], 1 }
  0x47   :  { %157 = vsyncpa [#allocation6], 1 }
  0x48   :  { %158 = vsyncpa [#allocation4], 1 }

</bundles_post_ra>
